<compile_context>
chip_gen: v7x
topology: tpu7x:2x2x1
jax: 0.10.0
libtpu: 0.0.40
codegen_flags: <defaults>
</compile_context>

<pallas_src>
import math

import jax
import jax.numpy as jnp
import numpy as np
from jax import lax
from jax.experimental import pallas as pl
from jax.experimental.pallas import tpu as pltpu


def _make_cdc_t_kernel(T, HW, K9, C_out):
    """One batch element per grid step; 3 accumulating per-dt MXU matmuls."""
    L = T * HW

    def kernel(x_ref, w_ref, o_ref):
        # x_ref: (1, K9, (T+2)*HW) bf16 -- im2col slab, padded-frame-major lanes
        # w_ref: (3, C_out, K9)    bf16 -- per-dt folded weights (theta in center tap)
        # o_ref: (1, C_out, T*HW)  f32  -- lane-dense consumer layout
        # dt*HW offsets are static multiples of 128 -> aligned, zero-cost views.
        acc = jnp.dot(w_ref[0], x_ref[0, :, pl.ds(0 * HW, L)],
                      preferred_element_type=jnp.float32)
        acc += jnp.dot(w_ref[1], x_ref[0, :, pl.ds(1 * HW, L)],
                       preferred_element_type=jnp.float32)
        acc += jnp.dot(w_ref[2], x_ref[0, :, pl.ds(2 * HW, L)],
                       preferred_element_type=jnp.float32)
        o_ref[0] = acc

    return kernel


def cdc_t_forward(x_ncdhw, weight, theta=0.6):
    """x_ncdhw: (N, C_in, T, H, W) f32; weight: (C_out, C_in, 3, 3, 3) f32."""
    N, C_in, T, H, W = x_ncdhw.shape
    C_out, C_in_w, kt, kh, kw = weight.shape
    assert C_in_w == C_in
    assert (kt, kh, kw) == (3, 3, 3), "CDC_T default config uses a 3x3x3 kernel"
    HW = H * W
    K9 = 9 * C_in
    assert HW % 128 == 0, "H*W must be a multiple of 128 for aligned lane slices"

    use_diff = (math.fabs(theta) >= 1e-8) and (kt > 1)

    # ---- weights: fold -theta * (spatial sums of dt=0 and dt=2 taps) into the
    # center tap (the 1x1x1 diff conv with padding=0 reads exactly that element).
    w_eff = weight.astype(jnp.float32)
    if use_diff:
        kdiff = weight[:, :, 0].sum((2, 3)) + weight[:, :, 2].sum((2, 3))  # (C_out, C_in)
        w_eff = w_eff.at[:, :, 1, 1, 1].add(-theta * kdiff)
    # (dt, C_out, C_in*3*3): row index c*9 + dh*3 + dw matches the channel-major
    # ordering of conv_general_dilated_patches.
    w_mat = jnp.transpose(w_eff, (2, 0, 1, 3, 4)).reshape(3, C_out, K9)
    w_mat = w_mat.astype(jnp.bfloat16)

    # ---- input: single fused im2col pass, bf16.  filter (1,3,3) with padding
    # (1,1) on all three dims gives spatial 3x3 patches AND two zero frames
    # (temporal conv padding) in one op: (N, 9*C_in, T+2, H, W).
    x_bf = x_ncdhw.astype(jnp.bfloat16)
    patches = lax.conv_general_dilated_patches(
        x_bf, filter_shape=(1, 3, 3), window_strides=(1, 1, 1),
        padding=((1, 1), (1, 1), (1, 1)))
    x_slab = patches.reshape(N, K9, (T + 2) * HW)   # trailing collapse: metadata only

    # ---- VMEM budget (v7x: 64 MiB physical; keep double-buffered blocks < ~48 MiB)
    x_block = K9 * (T + 2) * HW * 2          # bf16
    o_block = C_out * T * HW * 4             # f32
    w_bytes = 3 * C_out * K9 * 2
    vmem_need = 2 * x_block + 2 * o_block + w_bytes
    assert vmem_need <= 48 * 1024 * 1024, (
        "per-batch T-resident block exceeds the v7x VMEM budget; "
        "tile T with manual double-buffered DMA for this shape")

    kernel = _make_cdc_t_kernel(T, HW, K9, C_out)
    flops = 2 * N * C_out * (3 * K9) * (T * HW)
    bytes_accessed = x_slab.size * 2 + w_mat.size * 2 + N * C_out * T * HW * 4

    out = pl.pallas_call(
        kernel,
        out_shape=jax.ShapeDtypeStruct((N, C_out, T * HW), jnp.float32),
        grid=(N,),
        in_specs=[
            pl.BlockSpec((1, K9, (T + 2) * HW), lambda n: (n, 0, 0)),
            pl.BlockSpec((3, C_out, K9), lambda n: (0, 0, 0)),
        ],
        out_specs=pl.BlockSpec((1, C_out, T * HW), lambda n: (n, 0, 0)),
        compiler_params=pltpu.CompilerParams(
            dimension_semantics=("parallel",),
            vmem_limit_bytes=int(max(vmem_need + (4 << 20), 32 << 20))),
        cost_estimate=pl.CostEstimate(
            flops=flops, transcendentals=0, bytes_accessed=bytes_accessed),
    )(x_slab, w_mat)

    # (N, C_out, T*HW) -> (N, C_out, T, H, W): metadata-only split of the lane dim.
    return out.reshape(N, C_out, T, H, W)


def cdc_t_reference(x, weight, theta=0.6):
    """Pure-JAX f32 reference mirroring the PyTorch forward (NCDHW)."""
    dn = lax.conv_dimension_numbers(x.shape, weight.shape,
                                    ("NCDHW", "OIDHW", "NCDHW"))
    out_normal = lax.conv_general_dilated(
        x, weight, window_strides=(1, 1, 1), padding=[(1, 1)] * 3,
        dimension_numbers=dn, precision=jax.lax.Precision.HIGHEST)
    if math.fabs(theta - 0.0) < 1e-8 or weight.shape[2] <= 1:
        return out_normal
    kd = (weight[:, :, 0].sum((2, 3)) + weight[:, :, 2].sum((2, 3)))[:, :, None, None, None]
    out_diff = lax.conv_general_dilated(
        x, kd, window_strides=(1, 1, 1), padding=[(0, 0)] * 3,
        dimension_numbers=dn, precision=jax.lax.Precision.HIGHEST)
    return out_normal - theta * out_diff


if __name__ == "__main__":
    # Small shapes consistent with the module: N=2, C_in=4, C_out=8, T=8, H=W=16.
    N, C_in, C_out, T, H, W = 2, 4, 8, 8, 16, 16
    theta = 0.6

    key = jax.random.PRNGKey(0)
    kx, kw = jax.random.split(key)
    x = jax.random.normal(kx, (N, C_in, T, H, W), dtype=jnp.float32)
    # deterministic Conv3d-style init (kaiming-uniform bound = 1/sqrt(fan_in))
    fan_in = C_in * 3 * 3 * 3
    bound = 1.0 / math.sqrt(fan_in)
    weight = jax.random.uniform(kw, (C_out, C_in, 3, 3, 3),
                                minval=-bound, maxval=bound, dtype=jnp.float32)

    fwd = jax.jit(lambda xx, ww: cdc_t_forward(xx, ww, theta))
    out = jax.block_until_ready(fwd(x, weight))

    ref = jax.block_until_ready(cdc_t_reference(x, weight, theta))
    assert out.shape == (N, C_out, T, H, W)
    # bf16 slab/weights with f32 accumulation -> relaxed tolerance vs f32 reference.
    assert np.allclose(np.asarray(out), np.asarray(ref), rtol=2e-2, atol=3e-2), (
        "Pallas CDC_T output mismatch vs reference")

    print("KERNEL_OK")
</pallas_src>

<mosaic_0001>
module attributes {stable_mosaic.version = 11 : i64} {
  func.func @kernel(%arg0: i32, %arg1: memref<1x36x2560xbf16, #tpu.memory_space<vmem>>, %arg2: memref<3x8x36xbf16, #tpu.memory_space<vmem>>, %arg3: memref<1x8x2048xf32, #tpu.memory_space<vmem>>) attributes {dimension_semantics = [#tpu.dimension_semantics<parallel>], iteration_bounds = array<i64: 2>, scalar_prefetch = 0 : i64, scratch_operands = 0 : i64, tpu.core_type = #tpu.core_type<tc>, window_params = [{transform_indices = @transform_0, window_bounds = array<i64: 1, 36, 2560>}, {pipeline_mode = #tpu.pipeline_mode<synchronous>, transform_indices = @transform_1, window_bounds = array<i64: 3, 8, 36>}, {transform_indices = @transform_2, window_bounds = array<i64: 1, 8, 2048>}]} {
    %c0 = arith.constant 0 : index
    %c0_0 = arith.constant 0 : index
    %c0_1 = arith.constant 0 : index
    %0 = vector.load %arg2[%c0, %c0_0, %c0_1] : memref<3x8x36xbf16, #tpu.memory_space<vmem>>, vector<1x8x36xbf16>
    %1 = vector.shape_cast %0 : vector<1x8x36xbf16> to vector<8x36xbf16>
    %c0_2 = arith.constant 0 : index
    %c0_3 = arith.constant 0 : index
    %c0_4 = arith.constant 0 : index
    %2 = vector.load %arg1[%c0_2, %c0_3, %c0_4] : memref<1x36x2560xbf16, #tpu.memory_space<vmem>>, vector<1x36x2048xbf16>
    %3 = vector.shape_cast %2 : vector<1x36x2048xbf16> to vector<36x2048xbf16>
    %cst = arith.constant dense<0.000000e+00> : vector<8x2048xf32>
    %4 = tpu.matmul %1, %3, %cst {dimension_numbers = #tpu.dot_dimension_numbers<[1], [0], [0], [1], [0, 0, 1, 1], [], []>} : vector<8x36xbf16>, vector<36x2048xbf16>, vector<8x2048xf32> -> vector<8x2048xf32>
    %c1 = arith.constant 1 : index
    %c0_5 = arith.constant 0 : index
    %c0_6 = arith.constant 0 : index
    %5 = vector.load %arg2[%c1, %c0_5, %c0_6] : memref<3x8x36xbf16, #tpu.memory_space<vmem>>, vector<1x8x36xbf16>
    %6 = vector.shape_cast %5 : vector<1x8x36xbf16> to vector<8x36xbf16>
    %c0_7 = arith.constant 0 : index
    %c0_8 = arith.constant 0 : index
    %c256 = arith.constant 256 : index
    %7 = vector.load %arg1[%c0_7, %c0_8, %c256] : memref<1x36x2560xbf16, #tpu.memory_space<vmem>>, vector<1x36x2048xbf16>
    %8 = vector.shape_cast %7 : vector<1x36x2048xbf16> to vector<36x2048xbf16>
    %cst_9 = arith.constant dense<0.000000e+00> : vector<8x2048xf32>
    %9 = tpu.matmul %6, %8, %cst_9 {dimension_numbers = #tpu.dot_dimension_numbers<[1], [0], [0], [1], [0, 0, 1, 1], [], []>} : vector<8x36xbf16>, vector<36x2048xbf16>, vector<8x2048xf32> -> vector<8x2048xf32>
    %10 = arith.addf %4, %9 : vector<8x2048xf32>
    %c2 = arith.constant 2 : index
    %c0_10 = arith.constant 0 : index
    %c0_11 = arith.constant 0 : index
    %11 = vector.load %arg2[%c2, %c0_10, %c0_11] : memref<3x8x36xbf16, #tpu.memory_space<vmem>>, vector<1x8x36xbf16>
    %12 = vector.shape_cast %11 : vector<1x8x36xbf16> to vector<8x36xbf16>
    %c0_12 = arith.constant 0 : index
    %c0_13 = arith.constant 0 : index
    %c512 = arith.constant 512 : index
    %13 = vector.load %arg1[%c0_12, %c0_13, %c512] : memref<1x36x2560xbf16, #tpu.memory_space<vmem>>, vector<1x36x2048xbf16>
    %14 = vector.shape_cast %13 : vector<1x36x2048xbf16> to vector<36x2048xbf16>
    %cst_14 = arith.constant dense<0.000000e+00> : vector<8x2048xf32>
    %15 = tpu.matmul %12, %14, %cst_14 {dimension_numbers = #tpu.dot_dimension_numbers<[1], [0], [0], [1], [0, 0, 1, 1], [], []>} : vector<8x36xbf16>, vector<36x2048xbf16>, vector<8x2048xf32> -> vector<8x2048xf32>
    %16 = arith.addf %10, %15 : vector<8x2048xf32>
    %c0_15 = arith.constant 0 : index
    %c0_16 = arith.constant 0 : index
    %c0_17 = arith.constant 0 : index
    %17 = vector.load %arg3[%c0_15, %c0_16, %c0_17] : memref<1x8x2048xf32, #tpu.memory_space<vmem>>, vector<1x8x2048xf32>
    %18 = vector.shape_cast %17 : vector<1x8x2048xf32> to vector<8x2048xf32>
    %19 = vector.shape_cast %16 : vector<8x2048xf32> to vector<1x8x2048xf32>
    tpu.vector_store %arg3[%c0_15, %c0_16, %c0_17], %19 {strides = array<i32>} : memref<1x8x2048xf32, #tpu.memory_space<vmem>>, vector<1x8x2048xf32>,
    return
  }
  func.func @transform_0(%arg0: i32) -> (i32, i32, i32) {
    %c0_i32 = arith.constant 0 : i32
    %c0_i32_0 = arith.constant 0 : i32
    %c0_i32_1 = arith.constant 0 : i32
    return %arg0, %c0_i32, %c0_i32_0 : i32, i32, i32
  }
  func.func @transform_1(%arg0: i32) -> (i32, i32, i32) {
    %c0_i32 = arith.constant 0 : i32
    %c0_i32_0 = arith.constant 0 : i32
    %c0_i32_1 = arith.constant 0 : i32
    %c0_i32_2 = arith.constant 0 : i32
    return %c0_i32, %c0_i32_0, %c0_i32_1 : i32, i32, i32
  }
  func.func @transform_2(%arg0: i32) -> (i32, i32, i32) {
    %c0_i32 = arith.constant 0 : i32
    %c0_i32_0 = arith.constant 0 : i32
    %c0_i32_1 = arith.constant 0 : i32
    return %arg0, %c0_i32, %c0_i32_0 : i32, i32, i32
  }
}

</mosaic_0001>

<bundles_post_ra>
// kernel: _lambda_.1
= control target key start
LH: loop header
LB: loop body
LE: loop exit
PB: predicated region body
PF: predicated region fallthrough
CT: control target
= control target key end

     0   :  { %s2199_s9 = smov 0   ;;  %s2623_s0 = inlined_call_operand.vmem [shape: bf16[2,36,2560], index: 0, kind: input, shape index: {}]   ;;  %s2624_s1 = inlined_call_operand.vmem [shape: bf16[3,8,36], index: 1, kind: input, shape index: {}]   ;;  %s2625_s2 = inlined_call_operand.vmem [shape: f32[2,8,2048], index: 2, kind: output, shape index: {}]  }
   0x1 LB: > { %s1844_s10 = sadd.s32 4294967295, %s2181_s9   ;;  %p1848_p0 = scmp.ge.s32.totalorder %s2181_s9, 1  ;;  %s2181_s9 = sphi %s2199_s9, %s12_s9  }
   0x2   : > { %p112_p1 = scmp.lt.s32.totalorder %s2181_s9, 3 }
   0x4   : > { %p113_p2 = pnand %p1848_p0, %p112_p1 }
   0x5   : > { %p134_p3 = scmp.lt.s32.totalorder (!%p113_p2), %s1844_s10, 1  ;;  %v2183_v0 = vmov (!%p113_p2), 0   ;;  %vm397_vm0 = vcmask (!%p113_p2), 1041408   ;;  %v2280_v21 = vld [vmem:[%s2624_s1 + $0x4] sm:$0xf] (!%p113_p2)  ;;  %vm393_vm1 = vcmask (!%p113_p2), 293888  }
   0x6   : > { %116 = sbr.rel (%p113_p2) target bundleno = 377 (0x179), region = 28  ;;  %478 = vmatprep.mubr.bf16.mxu0 (!%p113_p2), %v2183_v0  ;;  %519 = vmatprep.mubr.bf16.mxu1 (!%p113_p2), %v2183_v0 }
   0xd   : > { %s2627_s10 = smov (!%p134_p3, %s1844_s10), 1 }
   0xe   : > { %s2071_s11 = smul.u32 400, %s2627_s10  ;;  %s2006_s21 = sshll.u32 %s2627_s10, 7 }
   0xf   : > { %s2602_s24 = scalar_lea.vmem %s2625_s2, %s2006_s21 }
  0x10   : > { %s2215_s14 = scalar_lea.vmem %s2623_s0, %s2071_s11 }
  0x11   : > { %v2218_v1 = vld [vmem:[%s2215_s14 + $0xc] ss:$80 sps:$4 sm:$0xff]   ;;  %v2221_v2 = vld [vmem:[%s2215_s14 + $0x14] ss:$80 sps:$4 sm:$0xff]   ;;  %v2225_v3 = vld [vmem:[%s2215_s14 + $0x8] ss:$80 sps:$4 sm:$0xff]  }
  0x12   : > { %446 = vmatprep.subr.bf16.mxu0 %v2218_v1  ;;  %v2228_v4 = vld [vmem:[%s2215_s14 + $0x10] ss:$80 sps:$4 sm:$0xff]   ;;  %487 = vmatprep.subr.bf16.mxu1 %v2221_v2  ;;  %v2232_v5 = vld [vmem:[%s2215_s14 + $0xac] ss:$80 sps:$4 sm:$0xff]   ;;  %v2237_v6 = vld [vmem:[%s2215_s14 + $0xb4] ss:$80 sps:$4 sm:$0xff]  }
  0x13   : > { %447 = vmatpush1.bf16.msra.mxu0 %v2225_v3  ;;  %488 = vmatpush1.bf16.msra.mxu1 %v2228_v4  ;;  %v2240_v7 = vld [vmem:[%s2215_s14 + $0xa8] ss:$80 sps:$4 sm:$0xff]   ;;  %v2244_v8 = vld [vmem:[%s2215_s14 + $0xb0] ss:$80 sps:$4 sm:$0xff]   ;;  %v2256_v15 = vld [vmem:[%s2215_s14 + $0x1c] ss:$80 sps:$4 sm:$0xff]  }
  0x14   : > { %448 = vmatprep.subr.bf16.mxu0 %v2232_v5  ;;  %v179_v9 = vld [vmem:[%s2215_s14 + $0x148] sm:$0x33]  ;;  %v180_v10 = vld [vmem:[%s2215_s14 + $0x150] sm:$0x33]  ;;  %489 = vmatprep.subr.bf16.mxu1 %v2237_v6  ;;  %v181_v24 = vld [vmem:[%s2215_s14 + $0x158] sm:$0x33] }
  0x15   : > { %v2249_v11 = vcombine.high %v179_v9, %v179_v9  ;;  %v2251_v12 = vcombine.high %v180_v10, %v180_v10  ;;  %v1885_v13 = vcombine.low %v179_v9, %v179_v9  ;;  %v1887_v14 = vcombine.low %v180_v10, %v180_v10  ;;  %v2269_v18 = vld [vmem:[%s2215_s14 + $0x24] ss:$80 sps:$4 sm:$0xff]   ;;  %v2272_v19 = vld [vmem:[%s2215_s14 + $0x18] ss:$80 sps:$4 sm:$0xff]   ;;  %v2275_v20 = vld [vmem:[%s2215_s14 + $0x20] ss:$80 sps:$4 sm:$0xff]  }
  0x16   : > { %v2285_v22 = vld [vmem:[%s2215_s14 + $0xbc] ss:$80 sps:$4 sm:$0xff]   ;;  %v2290_v23 = vld [vmem:[%s2215_s14 + $0xc4] ss:$80 sps:$4 sm:$0xff]   ;;  %v2299_v26 = vld [vmem:[%s2215_s14 + $0xb8] ss:$80 sps:$4 sm:$0xff]   ;;  %v2306_v28 = vcombine.high %v181_v24, %v181_v24  ;;  %v1889_v30 = vcombine.low %v181_v24, %v181_v24 }
  0x17   : > { %449 = vmatpush1.bf16.msra.mxu0 %v2240_v7  ;;  %490 = vmatpush1.bf16.msra.mxu1 %v2244_v8  ;;  %v2263_v16 = vsel %vm397_vm0, %v1885_v13, 0  ;;  %v2266_v17 = vsel %vm397_vm0, %v1887_v14, 0  ;;  %v182_v25 = vld [vmem:[%s2215_s14 + $0x160] sm:$0x33]  ;;  %v2317_v32 = vld [vmem:[%s2215_s14 + $0x2c] ss:$80 sps:$4 sm:$0xff]  }
  0x18   : > { %1901 = vmatprep.subr.msk.bf16.mxu0 %vm397_vm0, %v2249_v11  ;;  %1903 = vmatprep.subr.msk.bf16.mxu1 %vm397_vm0, %v2251_v12  ;;  %v2304_v27 = vld [vmem:[%s2215_s14 + $0xc0] ss:$80 sps:$4 sm:$0xff]   ;;  %v2310_v29 = vcombine.high %v182_v25, %v182_v25  ;;  %v1891_v31 = vcombine.low %v182_v25, %v182_v25  ;;  %v2324_v33 = vsel %vm397_vm0, %v1889_v30, 0  ;;  %v2330_v35 = vld [vmem:[%s2215_s14 + $0x34] ss:$80 sps:$4 sm:$0xff]  }
  0x19   : > { %v2333_v36 = vld [vmem:[%s2215_s14 + $0x28] ss:$80 sps:$4 sm:$0xff]   ;;  %v2336_v37 = vld [vmem:[%s2215_s14 + $0x30] ss:$80 sps:$4 sm:$0xff]   ;;  %v2341_v38 = vld [vmem:[%s2215_s14 + $0xcc] ss:$80 sps:$4 sm:$0xff]  }
  0x1a   : > { %v2327_v34 = vsel %vm397_vm0, %v1891_v31, 0  ;;  %v2346_v39 = vld [vmem:[%s2215_s14 + $0xd4] ss:$80 sps:$4 sm:$0xff]   ;;  %v183_v40 = vld [vmem:[%s2215_s14 + $0x168] sm:$0x33] }
  0x1b   : > { %451 = vmatpush1.bf16.msra.mxu0 %v2263_v16  ;;  %492 = vmatpush1.bf16.msra.mxu1 %v2266_v17  ;;  %v184_v41 = vld [vmem:[%s2215_s14 + $0x170] sm:$0x33]  ;;  %v2357_v42 = vld [vmem:[%s2215_s14 + $0xc8] ss:$80 sps:$4 sm:$0xff]   ;;  %v2362_v44 = vcombine.high %v183_v40, %v183_v40  ;;  %v1893_v46 = vcombine.low %v183_v40, %v183_v40  ;;  %v2383_v50 = vld [vmem:[%s2215_s14 + $0x3c] ss:$80 sps:$4 sm:$0xff]  }
  0x1c   : > { %528 = vmatprep.subr.bf16.mxu0 %v2256_v15  ;;  %569 = vmatprep.subr.bf16.mxu1 %v2269_v18  ;;  %v2360_v43 = vld [vmem:[%s2215_s14 + $0xd0] ss:$80 sps:$4 sm:$0xff]   ;;  %v2366_v45 = vcombine.high %v184_v41, %v184_v41  ;;  %v1895_v47 = vcombine.low %v184_v41, %v184_v41  ;;  %v2386_v51 = vld [vmem:[%s2215_s14 + $0x44] ss:$80 sps:$4 sm:$0xff]   ;;  %v2391_v52 = vld [vmem:[%s2215_s14 + $0x38] ss:$80 sps:$4 sm:$0xff]  }
  0x1d   : > { %v2377_v48 = vsel %vm397_vm0, %v1893_v46, 0  ;;  %v2394_v53 = vld [vmem:[%s2215_s14 + $0x40] ss:$80 sps:$4 sm:$0xff]   ;;  %v2399_v54 = vld [vmem:[%s2215_s14 + $0xdc] ss:$80 sps:$4 sm:$0xff]  }
  0x1e   : > { %1902 = vmatmul.mubr.msk.bf16.vlgmr.msra.gmra.mrb[0].mxu0 %vm393_vm1, %v2280_v21  ;;  %1904 = vmatmul.mubr.msk.bf16.vlgmr.msra.gmra.mrb[0].mxu1 %vm393_vm1, %v2280_v21  ;;  %v2380_v49 = vsel %vm397_vm0, %v1895_v47, 0  ;;  %v2402_v55 = vld [vmem:[%s2215_s14 + $0xe4] ss:$80 sps:$4 sm:$0xff]   ;;  %v185_v56 = vld [vmem:[%s2215_s14 + $0x178] sm:$0x33] }
  0x1f   : > { %529 = vmatpush1.bf16.msra.mxu0 %v2272_v19  ;;  %570 = vmatpush1.bf16.msra.mxu1 %v2275_v20  ;;  %v192_v57 = vld [vmem:[%s2215_s14 + $0x180] sm:$0x33]  ;;  %v2413_v58 = vld [vmem:[%s2215_s14 + $0xd8] ss:$80 sps:$4 sm:$0xff]   ;;  %v2418_v60 = vcombine.high %v185_v56, %v185_v56  ;;  %v1897_v62 = vcombine.low %v185_v56, %v185_v56 }
  0x20   : > { %530 = vmatprep.subr.bf16.mxu0 %v2285_v22  ;;  %571 = vmatprep.subr.bf16.mxu1 %v2290_v23  ;;  %v2416_v59 = vld [vmem:[%s2215_s14 + $0xe0] ss:$80 sps:$4 sm:$0xff]   ;;  %v1900_v61 = vcombine.high %v192_v57, %v192_v57  ;;  %v1899_v63 = vcombine.low %v192_v57, %v192_v57  ;;  %v2147_v13 = vld [vmem:[%s2215_s14 + $0x4] ss:$80 sps:$4 sm:$0xff]   ;;  %v1177_v41 = vld [vmem:[%s2215_s14 + $0x188] sm:$0x33] }
  0x21   : > { %560 = vmatprep.mubr.bf16.mxu0 %v2183_v0  ;;  %601 = vmatprep.mubr.bf16.mxu1 %v2183_v0  ;;  %v2430_v9 = vsel %vm397_vm0, %v1897_v62, 0  ;;  %v2145_v14 = vld [vmem:[%s2215_s14] ss:$80 sps:$4 sm:$0xff]   ;;  %v2150_v24 = vld [vmem:[%s2215_s14 + $0xa4] ss:$80 sps:$4 sm:$0xff]   ;;  %v1986_v46 = vcombine.low %v1177_v41, %v1177_v41 }
  0x22   : > { %v441_v10 = vsel %vm397_vm0, %v1899_v63, 0  ;;  %v178_v25 = vld [vmem:[%s2215_s14 + $0x140] sm:$0x33] }
  0x23   : > { %531 = vmatpush1.bf16.msra.mxu0 %v2299_v26  ;;  %572 = vmatpush1.bf16.msra.mxu1 %v2304_v27  ;;  %v2148_v30 = vld [vmem:[%s2215_s14 + $0xa0] ss:$80 sps:$4 sm:$0xff]   ;;  %v1922_v31 = vcombine.high %v178_v25, %v178_v25  ;;  %v1921_v40 = vcombine.low %v178_v25, %v178_v25 }
  0x24   : > { %1905 = vmatprep.subr.msk.bf16.mxu0 %vm397_vm0, %v2306_v28  ;;  %1907 = vmatprep.subr.msk.bf16.mxu1 %vm397_vm0, %v2310_v29 }
  0x27   : > { %533 = vmatpush1.bf16.msra.mxu0 %v2324_v33  ;;  %574 = vmatpush1.bf16.msra.mxu1 %v2327_v34 }
  0x28   : > { %610 = vmatprep.subr.bf16.mxu0 %v2317_v32  ;;  %651 = vmatprep.subr.bf16.mxu1 %v2330_v35 }
  0x2a   : > { %1906 = vmatmul.mubr.msk.bf16.vlgmr.msra.gmra.mrb[4].mxu0 %vm393_vm1, %v2280_v21  ;;  %1908 = vmatmul.mubr.msk.bf16.vlgmr.msra.gmra.mrb[4].mxu1 %vm393_vm1, %v2280_v21 }
  0x2b   : > { %611 = vmatpush1.bf16.msra.mxu0 %v2333_v36  ;;  %652 = vmatpush1.bf16.msra.mxu1 %v2336_v37 }
  0x2c   : > { %612 = vmatprep.subr.bf16.mxu0 %v2341_v38  ;;  %653 = vmatprep.subr.bf16.mxu1 %v2346_v39 }
  0x2d   : > { %642 = vmatprep.mubr.bf16.mxu0 %v2183_v0  ;;  %683 = vmatprep.mubr.bf16.mxu1 %v2183_v0 }
  0x2f   : > { %613 = vmatpush1.bf16.msra.mxu0 %v2357_v42  ;;  %654 = vmatpush1.bf16.msra.mxu1 %v2360_v43 }
  0x30   : > { %1909 = vmatprep.subr.msk.bf16.mxu0 %vm397_vm0, %v2362_v44  ;;  %1911 = vmatprep.subr.msk.bf16.mxu1 %vm397_vm0, %v2366_v45 }
  0x33   : > { %615 = vmatpush1.bf16.msra.mxu0 %v2377_v48  ;;  %656 = vmatpush1.bf16.msra.mxu1 %v2380_v49 }
  0x34   : > { %692 = vmatprep.subr.bf16.mxu0 %v2383_v50  ;;  %733 = vmatprep.subr.bf16.mxu1 %v2386_v51 }
  0x36   : > { %1910 = vmatmul.mubr.msk.bf16.vlgmr.msra.gmra.mrb[8].mxu0 %vm393_vm1, %v2280_v21  ;;  %1912 = vmatmul.mubr.msk.bf16.vlgmr.msra.gmra.mrb[8].mxu1 %vm393_vm1, %v2280_v21 }
  0x37   : > { %693 = vmatpush1.bf16.msra.mxu0 %v2391_v52  ;;  %734 = vmatpush1.bf16.msra.mxu1 %v2394_v53 }
  0x38   : > { %694 = vmatprep.subr.bf16.mxu0 %v2399_v54  ;;  %735 = vmatprep.subr.bf16.mxu1 %v2402_v55 }
  0x39   : > { %724 = vmatprep.mubr.bf16.mxu0 %v2183_v0  ;;  %765 = vmatprep.mubr.bf16.mxu1 %v2183_v0 }
  0x3b   : > { %695 = vmatpush1.bf16.msra.mxu0 %v2413_v58  ;;  %736 = vmatpush1.bf16.msra.mxu1 %v2416_v59 }
  0x3c   : > { %1913 = vmatprep.subr.msk.bf16.mxu0 %vm397_vm0, %v2418_v60  ;;  %1915 = vmatprep.subr.msk.bf16.mxu1 %vm397_vm0, %v1900_v61 }
  0x3f   : > { %697 = vmatpush1.bf16.msra.mxu0 %v2430_v9  ;;  %738 = vmatpush1.bf16.msra.mxu1 %v441_v10 }
  0x40   : > { %808 = vmatprep.subr.bf16.mxu0 %v2147_v13  ;;  %849 = vmatprep.subr.bf16.mxu1 %v2218_v1  ;;  %v803_v1 = vsel %vm397_vm0, %v1921_v40, 0 }
  0x42   : > { %1914 = vmatmul.mubr.msk.bf16.vlgmr.msra.gmra.mrb[12].mxu0 %vm393_vm1, %v2280_v21  ;;  %1916 = vmatmul.mubr.msk.bf16.vlgmr.msra.gmra.mrb[12].mxu1 %vm393_vm1, %v2280_v21 }
  0x43   : > { %809 = vmatpush1.bf16.msra.mxu0 %v2145_v14  ;;  %850 = vmatpush1.bf16.msra.mxu1 %v2225_v3  ;;  %v145_v3 = vld [vmem:[%s2624_s1] sm:$0xf] }
  0x44   : > { %810 = vmatprep.subr.bf16.mxu0 %v2150_v24  ;;  %851 = vmatprep.subr.bf16.mxu1 %v2232_v5  ;;  %v1170_v5 = vld [vmem:[%s2215_s14 + $0x150] sm:$0x33] }
  0x45   : > { %840 = vmatprep.mubr.bf16.mxu0 %v2183_v0  ;;  %881 = vmatprep.mubr.bf16.mxu1 %v2183_v0 }
  0x47   : > { %811 = vmatpush1.bf16.msra.mxu0 %v2148_v30  ;;  %852 = vmatpush1.bf16.msra.mxu1 %v2240_v7  ;;  %v1171_v7 = vld [vmem:[%s2215_s14 + $0x158] sm:$0x33] }
  0x48   : > { %1923 = vmatprep.subr.msk.bf16.mxu0 %vm397_vm0, %v1922_v31  ;;  %1925 = vmatprep.subr.msk.bf16.mxu1 %vm397_vm0, %v2249_v11  ;;  %v1973_v11 = vcombine.high %v1170_v5, %v1170_v5 }
  0x4b   : > { %813 = vmatpush1.bf16.msra.mxu0 %v803_v1  ;;  %854 = vmatpush1.bf16.msra.mxu1 %v2263_v16  ;;  %v2532_v16 = vld [vmem:[%s2624_s1 + $0x8] sm:$0xf] }
  0x4c   : > { %890 = vmatprep.subr.bf16.mxu0 %v2221_v2  ;;  %931 = vmatprep.subr.bf16.mxu1 %v2256_v15 }
  0x4e   : > { %1924 = vmatmul.mubr.msk.bf16.vlgmr.msra.gmra.mrb[0].mxu0 %vm393_vm1, %v145_v3  ;;  %1926 = vmatmul.mubr.msk.bf16.vlgmr.msra.gmra.mrb[0].mxu1 %vm393_vm1, %v145_v3 }
  0x4f   : > { %891 = vmatpush1.bf16.msra.mxu0 %v2228_v4  ;;  %932 = vmatpush1.bf16.msra.mxu1 %v2272_v19 }
  0x50   : > { %892 = vmatprep.subr.bf16.mxu0 %v2237_v6  ;;  %933 = vmatprep.subr.bf16.mxu1 %v2285_v22 }
  0x51   : > { %922 = vmatprep.mubr.bf16.mxu0 %v2183_v0  ;;  %963 = vmatprep.mubr.bf16.mxu1 %v2183_v0 }
  0x53   : > { %893 = vmatpush1.bf16.msra.mxu0 %v2244_v8  ;;  %934 = vmatpush1.bf16.msra.mxu1 %v2299_v26 }
  0x54   : > { %1927 = vmatprep.subr.msk.bf16.mxu0 %vm397_vm0, %v2251_v12  ;;  %1929 = vmatprep.subr.msk.bf16.mxu1 %vm397_vm0, %v2306_v28  ;;  %v1975_v12 = vcombine.high %v1171_v7, %v1171_v7  ;;  %v1175_v28 = vld [vmem:[%s2215_s14 + $0x178] sm:$0x33] }
  0x57   : > { %895 = vmatpush1.bf16.msra.mxu0 %v2266_v17  ;;  %936 = vmatpush1.bf16.msra.mxu1 %v2324_v33  ;;  %v1173_v17 = vld [vmem:[%s2215_s14 + $0x168] sm:$0x33]  ;;  %v1982_v33 = vcombine.low %v1175_v28, %v1175_v28 }
  0x58   : > { %972 = vmatprep.subr.bf16.mxu0 %v2269_v18  ;;  %1013 = vmatprep.subr.bf16.mxu1 %v2317_v32 }
  0x5a   : > { %1928 = vmatmul.mubr.msk.bf16.vlgmr.msra.gmra.mrb[4].mxu0 %vm393_vm1, %v145_v3  ;;  %1930 = vmatmul.mubr.msk.bf16.vlgmr.msra.gmra.mrb[4].mxu1 %vm393_vm1, %v145_v3 }
  0x5b   : > { %973 = vmatpush1.bf16.msra.mxu0 %v2275_v20  ;;  %1014 = vmatpush1.bf16.msra.mxu1 %v2333_v36 }
  0x5c   : > { %974 = vmatprep.subr.bf16.mxu0 %v2290_v23  ;;  %1015 = vmatprep.subr.bf16.mxu1 %v2341_v38 }
  0x5d   : > { %1004 = vmatprep.mubr.bf16.mxu0 %v2183_v0  ;;  %1045 = vmatprep.mubr.bf16.mxu1 %v2183_v0 }
  0x5f   : > { %975 = vmatpush1.bf16.msra.mxu0 %v2304_v27  ;;  %1016 = vmatpush1.bf16.msra.mxu1 %v2357_v42 }
  0x60   : > { %1931 = vmatprep.subr.msk.bf16.mxu0 %vm397_vm0, %v2310_v29  ;;  %1933 = vmatprep.subr.msk.bf16.mxu1 %vm397_vm0, %v2362_v44  ;;  %v1983_v29 = vcombine.high %v1175_v28, %v1175_v28  ;;  %v1987_v44 = vcombine.high %v1177_v41, %v1177_v41 }
  0x63   : > { %977 = vmatpush1.bf16.msra.mxu0 %v2327_v34  ;;  %1018 = vmatpush1.bf16.msra.mxu1 %v2377_v48  ;;  %v1424_v48 = vsel %vm397_vm0, %v1986_v46, 0 }
  0x64   : > { %1054 = vmatprep.subr.bf16.mxu0 %v2330_v35  ;;  %1095 = vmatprep.subr.bf16.mxu1 %v2383_v50 }
  0x66   : > { %1932 = vmatmul.mubr.msk.bf16.vlgmr.msra.gmra.mrb[8].mxu0 %vm393_vm1, %v145_v3  ;;  %1934 = vmatmul.mubr.msk.bf16.vlgmr.msra.gmra.mrb[8].mxu1 %vm393_vm1, %v145_v3 }
  0x67   : > { %1055 = vmatpush1.bf16.msra.mxu0 %v2336_v37  ;;  %1096 = vmatpush1.bf16.msra.mxu1 %v2391_v52 }
  0x68   : > { %1056 = vmatprep.subr.bf16.mxu0 %v2346_v39  ;;  %1097 = vmatprep.subr.bf16.mxu1 %v2399_v54 }
  0x69   : > { %1086 = vmatprep.mubr.bf16.mxu0 %v2183_v0  ;;  %1127 = vmatprep.mubr.bf16.mxu1 %v2183_v0 }
  0x6b   : > { %1057 = vmatpush1.bf16.msra.mxu0 %v2360_v43  ;;  %1098 = vmatpush1.bf16.msra.mxu1 %v2413_v58 }
  0x6c   : > { %1935 = vmatprep.subr.msk.bf16.mxu0 %vm397_vm0, %v2366_v45  ;;  %1937 = vmatprep.subr.msk.bf16.mxu1 %vm397_vm0, %v2418_v60 }
  0x6f   : > { %1059 = vmatpush1.bf16.msra.mxu0 %v2380_v49  ;;  %1100 = vmatpush1.bf16.msra.mxu1 %v2430_v9 }
  0x70   : > { %1429 = vmatprep.subr.bf16.mxu0 %v2221_v2  ;;  %1470 = vmatprep.subr.bf16.mxu1 %v2256_v15  ;;  %v1972_v2 = vcombine.low %v1170_v5, %v1170_v5  ;;  %v1974_v15 = vcombine.low %v1171_v7, %v1171_v7 }
  0x72   : > { %1936 = vmatmul.mubr.msk.bf16.vlgmr.msra.gmra.mrb[12].mxu0 %vm393_vm1, %v145_v3  ;;  %1938 = vmatmul.mubr.msk.bf16.vlgmr.msra.gmra.mrb[12].mxu1 %vm393_vm1, %v145_v3 }
  0x73   : > { %1430 = vmatpush1.bf16.msra.mxu0 %v2228_v4  ;;  %1471 = vmatpush1.bf16.msra.mxu1 %v2272_v19  ;;  %v1382_v4 = vsel %vm397_vm0, %v1972_v2, 0 }
  0x74   : > { %1431 = vmatprep.subr.bf16.mxu0 %v2237_v6  ;;  %1472 = vmatprep.subr.bf16.mxu1 %v2285_v22  ;;  %v1388_v6 = vsel %vm397_vm0, %v1974_v15, 0  ;;  %v1978_v22 = vcombine.low %v1173_v17, %v1173_v17 }
  0x75   : > { %1461 = vmatprep.mubr.bf16.mxu0 %v2183_v0  ;;  %1502 = vmatprep.mubr.bf16.mxu1 %v2183_v0 }
  0x77   : > { %1432 = vmatpush1.bf16.msra.mxu0 %v2244_v8  ;;  %1473 = vmatpush1.bf16.msra.mxu1 %v2299_v26  ;;  %v1172_v8 = vld [vmem:[%s2215_s14 + $0x160] sm:$0x33]  ;;  %v1174_v26 = vld [vmem:[%s2215_s14 + $0x170] sm:$0x33] }
  0x78   : > { %1988 = vmatprep.subr.msk.bf16.mxu0 %vm397_vm0, %v1973_v11  ;;  %1990 = vmatprep.subr.msk.bf16.mxu1 %vm397_vm0, %v1975_v12  ;;  %v1977_v19 = vcombine.high %v1172_v8, %v1172_v8  ;;  %v1976_v21 = vcombine.low %v1172_v8, %v1172_v8 }
  0x7b   : > { %1434 = vmatpush1.bf16.msra.mxu0 %v1382_v4  ;;  %1475 = vmatpush1.bf16.msra.mxu1 %v1388_v6 }
  0x7c   : > { %1511 = vmatprep.subr.bf16.mxu0 %v2269_v18  ;;  %1552 = vmatprep.subr.bf16.mxu1 %v2317_v32  ;;  %v1979_v18 = vcombine.high %v1173_v17, %v1173_v17  ;;  %v1980_v32 = vcombine.low %v1174_v26, %v1174_v26 }
  0x7e   : > { %1989 = vmatmul.mubr.msk.bf16.vlgmr.msra.gmra.mrb[0].mxu0 %vm393_vm1, %v2532_v16  ;;  %1991 = vmatmul.mubr.msk.bf16.vlgmr.msra.gmra.mrb[0].mxu1 %vm393_vm1, %v2532_v16  ;;  %v1406_v34 = vsel %vm397_vm0, %v1980_v32, 0 }
  0x7f   : > { %1512 = vmatpush1.bf16.msra.mxu0 %v2275_v20  ;;  %1553 = vmatpush1.bf16.msra.mxu1 %v2333_v36  ;;  %v1394_v20 = vsel %vm397_vm0, %v1976_v21, 0  ;;  %v2167_v36 = vld [vmem:[%s2215_s14 + $0x4c] ss:$80 sps:$4 sm:$0xff]  }
  0x80   : > { %1513 = vmatprep.subr.bf16.mxu0 %v2290_v23  ;;  %1554 = vmatprep.subr.bf16.mxu1 %v2341_v38  ;;  %v1400_v23 = vsel %vm397_vm0, %v1978_v22, 0  ;;  %v2170_v38 = vld [vmem:[%s2215_s14 + $0xec] ss:$80 sps:$4 sm:$0xff]  }
  0x81   : > { %1543 = vmatprep.mubr.bf16.mxu0 %v2183_v0  ;;  %1584 = vmatprep.mubr.bf16.mxu1 %v2183_v0 }
  0x83   : > { %1514 = vmatpush1.bf16.msra.mxu0 %v2304_v27  ;;  %1555 = vmatpush1.bf16.msra.mxu1 %v2357_v42  ;;  %v1981_v27 = vcombine.high %v1174_v26, %v1174_v26  ;;  %v2168_v42 = vld [vmem:[%s2215_s14 + $0xe8] ss:$80 sps:$4 sm:$0xff]  }
  0x84   : > { %1992 = vmatprep.subr.msk.bf16.mxu0 %vm397_vm0, %v1977_v19  ;;  %1994 = vmatprep.subr.msk.bf16.mxu1 %vm397_vm0, %v1979_v18 }
  0x87   : > { %1516 = vmatpush1.bf16.msra.mxu0 %v1394_v20  ;;  %1557 = vmatpush1.bf16.msra.mxu1 %v1400_v23 }
  0x88   : > { %1593 = vmatprep.subr.bf16.mxu0 %v2330_v35  ;;  %1634 = vmatprep.subr.bf16.mxu1 %v2383_v50  ;;  %v1412_v35 = vsel %vm397_vm0, %v1982_v33, 0 }
  0x8a   : > { %1993 = vmatmul.mubr.msk.bf16.vlgmr.msra.gmra.mrb[4].mxu0 %vm393_vm1, %v2532_v16  ;;  %1995 = vmatmul.mubr.msk.bf16.vlgmr.msra.gmra.mrb[4].mxu1 %vm393_vm1, %v2532_v16 }
  0x8b   : > { %1594 = vmatpush1.bf16.msra.mxu0 %v2336_v37  ;;  %1635 = vmatpush1.bf16.msra.mxu1 %v2391_v52  ;;  %v2165_v37 = vld [vmem:[%s2215_s14 + $0x48] ss:$80 sps:$4 sm:$0xff]  }
  0x8c   : > { %1595 = vmatprep.subr.bf16.mxu0 %v2346_v39  ;;  %1636 = vmatprep.subr.bf16.mxu1 %v2399_v54  ;;  %v1176_v39 = vld [vmem:[%s2215_s14 + $0x180] sm:$0x33] }
  0x8d   : > { %1625 = vmatprep.mubr.bf16.mxu0 %v2183_v0  ;;  %1666 = vmatprep.mubr.bf16.mxu1 %v2183_v0  ;;  %v1984_v45 = vcombine.low %v1176_v39, %v1176_v39 }
  0x8f   : > { %1596 = vmatpush1.bf16.msra.mxu0 %v2360_v43  ;;  %1637 = vmatpush1.bf16.msra.mxu1 %v2413_v58  ;;  %v1985_v43 = vcombine.high %v1176_v39, %v1176_v39  ;;  %v1418_v47 = vsel %vm397_vm0, %v1984_v45, 0 }
  0x90   : > { %1996 = vmatprep.subr.msk.bf16.mxu0 %vm397_vm0, %v1981_v27  ;;  %1998 = vmatprep.subr.msk.bf16.mxu1 %vm397_vm0, %v1983_v29 }
  0x93   : > { %1598 = vmatpush1.bf16.msra.mxu0 %v1406_v34  ;;  %1639 = vmatpush1.bf16.msra.mxu1 %v1412_v35 }
  0x94   : > { %1675 = vmatprep.subr.bf16.mxu0 %v2386_v51  ;;  %1716 = vmatprep.subr.bf16.mxu1 %v2167_v36 }
  0x96   : > { %1997 = vmatmul.mubr.msk.bf16.vlgmr.msra.gmra.mrb[8].mxu0 %vm393_vm1, %v2532_v16  ;;  %1999 = vmatmul.mubr.msk.bf16.vlgmr.msra.gmra.mrb[8].mxu1 %vm393_vm1, %v2532_v16 }
  0x97   : > { %1676 = vmatpush1.bf16.msra.mxu0 %v2394_v53  ;;  %1717 = vmatpush1.bf16.msra.mxu1 %v2165_v37 }
  0x98   : > { %1677 = vmatprep.subr.bf16.mxu0 %v2402_v55  ;;  %1718 = vmatprep.subr.bf16.mxu1 %v2170_v38 }
  0x99   : > { %1707 = vmatprep.mubr.bf16.mxu0 %v2183_v0  ;;  %1748 = vmatprep.mubr.bf16.mxu1 %v2183_v0 }
  0x9b   : > { %1678 = vmatpush1.bf16.msra.mxu0 %v2416_v59  ;;  %1719 = vmatpush1.bf16.msra.mxu1 %v2168_v42 }
  0x9c   : > { %2000 = vmatprep.subr.msk.bf16.mxu0 %vm397_vm0, %v1985_v43  ;;  %2002 = vmatprep.subr.msk.bf16.mxu1 %vm397_vm0, %v1987_v44 }
  0x9f   : > { %1680 = vmatpush1.bf16.msra.mxu0 %v1418_v47  ;;  %1721 = vmatpush1.bf16.msra.mxu1 %v1424_v48 }
  0xa2   : > { %2001 = vmatmul.mubr.msk.bf16.vlgmr.msra.gmra.mrb[12].mxu0 %vm393_vm1, %v2532_v16  ;;  %2003 = vmatmul.mubr.msk.bf16.vlgmr.msra.gmra.mrb[12].mxu1 %vm393_vm1, %v2532_v16 }
 0x151   : > { %v1463_v0 = vpop.f32.mrb[0].mxu0  ;;  %v1504_v49 = vpop.f32.mrb[0].mxu1 }
 0x152   : > { %1773 = vst [vmem:[%s2602_s24] sm:$0xff] %v1463_v0  ;;  %1775 = vst [vmem:[%s2602_s24 + $0x10] sm:$0xff] %v1504_v49  ;;  %v1465_v50 = vpop.f32.mrb[1].mxu0  ;;  %v1506_v51 = vpop.f32.mrb[1].mxu1 }
 0x153   : > { %1774 = vst [vmem:[%s2602_s24 + $0x8] sm:$0xff] %v1465_v50  ;;  %1776 = vst [vmem:[%s2602_s24 + $0x18] sm:$0xff] %v1506_v51  ;;  %v1467_v52 = vpop.f32.mrb[2].mxu0  ;;  %v1508_v53 = vpop.f32.mrb[2].mxu1 }
 0x154   : > { %v1468_v54 = vpop.f32.mrb[3].mxu0  ;;  %v1509_v55 = vpop.f32.mrb[3].mxu1 }
 0x15d   : > { %v1545_v56 = vpop.f32.mrb[4].mxu0  ;;  %v1586_v57 = vpop.f32.mrb[4].mxu1 }
 0x15e   : > { %1777 = vst [vmem:[%s2602_s24 + $0x20] sm:$0xff] %v1545_v56  ;;  %1779 = vst [vmem:[%s2602_s24 + $0x30] sm:$0xff] %v1586_v57  ;;  %v1547_v58 = vpop.f32.mrb[5].mxu0  ;;  %v1588_v59 = vpop.f32.mrb[5].mxu1 }
 0x15f   : > { %1778 = vst [vmem:[%s2602_s24 + $0x28] sm:$0xff] %v1547_v58  ;;  %1780 = vst [vmem:[%s2602_s24 + $0x38] sm:$0xff] %v1588_v59  ;;  %v1549_v60 = vpop.f32.mrb[6].mxu0  ;;  %v1590_v61 = vpop.f32.mrb[6].mxu1 }
 0x160   : > { %v1550_v62 = vpop.f32.mrb[7].mxu0  ;;  %v1591_v63 = vpop.f32.mrb[7].mxu1 }
 0x169   : > { %v1627_v9 = vpop.f32.mrb[8].mxu0  ;;  %v1668_v10 = vpop.f32.mrb[8].mxu1 }
 0x16a   : > { %1781 = vst [vmem:[%s2602_s24 + $0x40] sm:$0xff] %v1627_v9  ;;  %1783 = vst [vmem:[%s2602_s24 + $0x50] sm:$0xff] %v1668_v10  ;;  %v1629_v13 = vpop.f32.mrb[9].mxu0  ;;  %v1670_v14 = vpop.f32.mrb[9].mxu1 }
 0x16b   : > { %1782 = vst [vmem:[%s2602_s24 + $0x48] sm:$0xff] %v1629_v13  ;;  %1784 = vst [vmem:[%s2602_s24 + $0x58] sm:$0xff] %v1670_v14  ;;  %v1631_v24 = vpop.f32.mrb[10].mxu0  ;;  %v1672_v25 = vpop.f32.mrb[10].mxu1 }
 0x16c   : > { %v1632_v30 = vpop.f32.mrb[11].mxu0  ;;  %v1673_v31 = vpop.f32.mrb[11].mxu1 }
 0x175   : > { %v1709_v40 = vpop.f32.mrb[12].mxu0  ;;  %v1750_v1 = vpop.f32.mrb[12].mxu1 }
 0x176   : > { %1785 = vst [vmem:[%s2602_s24 + $0x60] sm:$0xff] %v1709_v40  ;;  %1787 = vst [vmem:[%s2602_s24 + $0x70] sm:$0xff] %v1750_v1  ;;  %v1711_v3 = vpop.f32.mrb[13].mxu0  ;;  %v1752_v5 = vpop.f32.mrb[13].mxu1 }
 0x177   : > { %1786 = vst [vmem:[%s2602_s24 + $0x68] sm:$0xff] %v1711_v3  ;;  %1788 = vst [vmem:[%s2602_s24 + $0x78] sm:$0xff] %v1752_v5  ;;  %v1713_v7 = vpop.f32.mrb[14].mxu0  ;;  %v1754_v11 = vpop.f32.mrb[14].mxu1 }
 0x178   : > { %v1714_v12 = vpop.f32.mrb[15].mxu0  ;;  %v1755_v2 = vpop.f32.mrb[15].mxu1 }
 0x179 PF: > { %s12_s9 = sadd.s32 1, %s2181_s9  }
 0x17a   : > { %p9_p4 = scmp.ge.s32.totalorder %s12_s9, 4  }
 0x17c   :  { %11 = sbr.rel (!%p9_p4) target bundleno = 1 (0x1), region = 60 }

</bundles_post_ra>
